<compile_context>
chip_gen: v5e
topology: v5e:2x2
jax: 0.10.0
libtpu: 0.0.40
codegen_flags: <defaults>
</compile_context>

<pallas_src>
import jax
import jax.numpy as jnp
from jax.experimental import pallas as pl
from jax.experimental.pallas import tpu as pltpu


def _round_up(n, m):
    return ((n + m - 1) // m) * m


# ----------------------------- Pallas kernel ------------------------------ #

def _actor_fused_kernel(xt_ref, w0_ref, b0_ref, w1_ref, b1_ref,
                        probs_ref, logp_ref):
    """Fused fc_0 + ReLU + fc_1 + softmax, batch on the lane axis.

    xt_ref : (S, TB)  x^T column block (compute dtype, e.g. bf16)
    w0_ref : (Hp, S)  torch-layout fc_0 weight, hidden zero-padded to Hp
    b0_ref : (Hp, 1)  fc_0 bias (f32, zero-padded)
    w1_ref : (A, Hp)  torch-layout fc_1 weight (f32, hidden zero-padded)
    b1_ref : (A, 1)   fc_1 bias (f32)
    probs_ref / logp_ref : (A, TB) softmax probabilities / log-probabilities
    """
    xt = xt_ref[...]                                                 # (S, TB)
    # fc_0 + ReLU:   h^T = relu(W0 @ x^T + b0)
    h = jnp.dot(w0_ref[...], xt, preferred_element_type=jnp.float32)  # (Hp,TB)
    h = jnp.maximum(h + b0_ref[...], 0.0)
    # fc_1:          logits^T = W1 @ h^T + b1   (K = Hp = 128, lane aligned)
    logits = jnp.dot(w1_ref[...], h, preferred_element_type=jnp.float32)
    logits = logits + b1_ref[...]                                    # (A, TB)
    # Stable softmax over the action axis (axis 0 here), log-prob epilogue:
    # probs = exp(logp)  ->  no divide, exp/log live on the EUP slot.
    m = jnp.max(logits, axis=0, keepdims=True)
    shifted = logits - m
    lse = jnp.log(jnp.sum(jnp.exp(shifted), axis=0, keepdims=True))
    logp = shifted - lse
    logp_ref[...] = logp.astype(logp_ref.dtype)
    probs_ref[...] = jnp.exp(logp).astype(probs_ref.dtype)


# --------------------------------- wrapper --------------------------------- #

def actor_forward(params, x, *, block_b=2048):
    """Pallas-backed ActorNN forward.

    params : prepared params (see prepare_params), torch-layout weights with
             the hidden dim zero-padded to a multiple of 128.
    x      : (B, state_space) or (state_space,).
    Returns (probs, log_probs), each of shape (B, action_space)
    (or (1, action_space) for an unbatched input, matching the torch reshape).
    """
    if x.ndim == 1:                       # torch's unbatched path -> (1, A)
        x = x[None, :]
    B, S = x.shape
    Hp = params["w0"].shape[0]
    A = params["w1"].shape[0]
    compute_dtype = params["w0"].dtype

    # Layout plumbing (single fused XLA op): batch onto the lane axis and cast
    # the dominant HBM input to the compute dtype (bf16 by default).
    xt = x.T.astype(compute_dtype)                          # (S, B)

    # Batch block size along the lane axis.
    if B <= 256:
        TB = B          # one block; lane dim == full array dim needs no align
    else:
        # >=2 grid steps so ("parallel",) shards across v7x's two TensorCores;
        # 1024-4096 is the sweet spot (sweep block_b); multiple of 128 lanes.
        TB = min(block_b, _round_up(pl.cdiv(B, 2), 128))
    grid = (pl.cdiv(B, TB),)   # ragged tail: OOB reads garbage (column-local),
                               # OOB writes dropped -> no wrapper jnp.pad copy.

    probs_t, logp_t = pl.pallas_call(
        _actor_fused_kernel,
        out_shape=(jax.ShapeDtypeStruct((A, B), jnp.float32),
                   jax.ShapeDtypeStruct((A, B), jnp.float32)),
        grid_spec=pltpu.PrefetchScalarGridSpec(
            num_scalar_prefetch=0,
            grid=grid,
            in_specs=[
                pl.BlockSpec((S, TB), lambda i: (0, i)),    # x^T column block
                pl.BlockSpec((Hp, S), lambda i: (0, 0)),    # W0 (replicated)
                pl.BlockSpec((Hp, 1), lambda i: (0, 0)),    # b0
                pl.BlockSpec((A, Hp), lambda i: (0, 0)),    # W1
                pl.BlockSpec((A, 1), lambda i: (0, 0)),     # b1
            ],
            out_specs=[
                pl.BlockSpec((A, TB), lambda i: (0, i)),    # probs^T
                pl.BlockSpec((A, TB), lambda i: (0, i)),    # logp^T
            ],
        ),
        compiler_params=pltpu.CompilerParams(
            dimension_semantics=("parallel",),      # megacore on v7x
            vmem_limit_bytes=32 * 1024 * 1024,      # > v5e 16 MiB default,
        ),                                          # < v7x 64 MiB physical
    )(xt, params["w0"], params["b0"], params["w1"], params["b1"])

    return probs_t.T, logp_t.T


# ---------------------------- params / reference --------------------------- #

def init_params(key, state_space, action_space, hidden=100):
    """torch.nn.Linear-style init, torch parameter layout (out, in)."""
    def uniform(k, shape, fan_in):
        bound = 1.0 / float(fan_in) ** 0.5
        return jax.random.uniform(k, shape, jnp.float32, -bound, bound)

    ks = jax.random.split(key, 4)
    return dict(
        fc0_w=uniform(ks[0], (hidden, state_space), state_space),
        fc0_b=uniform(ks[1], (hidden,), state_space),
        fc1_w=uniform(ks[2], (action_space, hidden), hidden),
        fc1_b=uniform(ks[3], (action_space,), hidden),
    )


def prepare_params(tparams, compute_dtype=jnp.bfloat16):
    """One-time layout prep (hoisted out of the per-call path).

    Keeps torch (out, in) weight layout, zero-pads the hidden dim to a
    multiple of 128 (exact under ReLU), and stores the first-matmul operand in
    the compute dtype.  Accumulation / softmax operands stay f32.
    """
    w0 = jnp.asarray(tparams["fc0_w"], jnp.float32)   # (H, S)
    b0 = jnp.asarray(tparams["fc0_b"], jnp.float32)   # (H,)
    w1 = jnp.asarray(tparams["fc1_w"], jnp.float32)   # (A, H)
    b1 = jnp.asarray(tparams["fc1_b"], jnp.float32)   # (A,)
    H, S = w0.shape
    A = w1.shape[0]
    Hp = _round_up(H, 128)

    w0p = jnp.zeros((Hp, S), jnp.float32).at[:H, :].set(w0)
    b0p = jnp.zeros((Hp, 1), jnp.float32).at[:H, 0].set(b0)
    w1p = jnp.zeros((A, Hp), jnp.float32).at[:, :H].set(w1)
    b1p = b1.reshape(A, 1)

    return dict(
        w0=w0p.astype(compute_dtype),   # (Hp, S) — first MXU operand
        b0=b0p,                         # (Hp, 1) f32
        w1=w1p,                         # (A, Hp) f32
        b1=b1p,                         # (A, 1)  f32
    )


def reference_forward(tparams, x):
    """Pure-JAX reference (same math as the torch module)."""
    if x.ndim == 1:
        x = x[None, :]
    h = jax.nn.relu(x @ tparams["fc0_w"].T + tparams["fc0_b"])
    logits = h @ tparams["fc1_w"].T + tparams["fc1_b"]
    return jax.nn.softmax(logits, axis=-1)


# ----------------------------------- main ---------------------------------- #

if __name__ == "__main__":
    state_space, action_space, hidden = 4, 2, 100    # CartPole-sized ActorNN

    key = jax.random.PRNGKey(0)
    pkey, xkey, xkey2 = jax.random.split(key, 3)
    tparams = init_params(pkey, state_space, action_space, hidden)

    # --- small rollout-sized batch, exact f32 path, single block ------------
    x_small = jax.random.normal(xkey, (2, state_space), jnp.float32)
    ref = reference_forward(tparams, x_small)
    params_f32 = prepare_params(tparams, compute_dtype=jnp.float32)
    probs, logp = jax.block_until_ready(actor_forward(params_f32, x_small))
    assert probs.shape == (2, action_space), probs.shape
    assert jnp.allclose(probs, ref, atol=1e-5, rtol=1e-5), (probs, ref)
    assert jnp.allclose(logp, jnp.log(ref), atol=1e-5, rtol=1e-5)
    assert jnp.allclose(probs.sum(-1), 1.0, atol=1e-5)

    # --- unbatched path (torch reshapes to (1, A) before softmax) -----------
    probs1, _ = jax.block_until_ready(actor_forward(params_f32, x_small[0]))
    assert probs1.shape == (1, action_space), probs1.shape
    assert jnp.allclose(probs1, ref[:1], atol=1e-5, rtol=1e-5)

    # --- training-sized batch: multi-block grid + ragged tail, f32 ----------
    B = 700
    x_big = jax.random.normal(xkey2, (B, state_space), jnp.float32)
    ref_big = reference_forward(tparams, x_big)
    probs_big, logp_big = jax.block_until_ready(
        actor_forward(params_f32, x_big, block_b=256))   # 3 grid steps, ragged
    assert probs_big.shape == (B, action_space)
    assert jnp.allclose(probs_big, ref_big, atol=1e-5, rtol=1e-5)
    assert jnp.allclose(logp_big, jnp.log(ref_big), atol=1e-5, rtol=1e-5)

    # --- same batch through the default bf16-input path ---------------------
    params_bf16 = prepare_params(tparams, compute_dtype=jnp.bfloat16)
    probs_bf, logp_bf = jax.block_until_ready(actor_forward(params_bf16, x_big))
    assert probs_bf.shape == (B, action_space)
    assert jnp.allclose(probs_bf, ref_big, atol=2e-2, rtol=2e-2)
    assert jnp.allclose(probs_bf.sum(-1), 1.0, atol=1e-3)

    print("KERNEL_OK")
</pallas_src>

<mosaic_0001>
module attributes {stable_mosaic.version = 11 : i64} {
  func.func @_actor_fused_kernel(%arg0: i32, %arg1: memref<4x2xf32, #tpu.memory_space<vmem>>, %arg2: memref<128x4xf32, #tpu.memory_space<vmem>>, %arg3: memref<128x1xf32, #tpu.memory_space<vmem>>, %arg4: memref<2x128xf32, #tpu.memory_space<vmem>>, %arg5: memref<2x1xf32, #tpu.memory_space<vmem>>, %arg6: memref<2x2xf32, #tpu.memory_space<vmem>>, %arg7: memref<2x2xf32, #tpu.memory_space<vmem>>) attributes {dimension_semantics = [#tpu.dimension_semantics<parallel>], iteration_bounds = array<i64: 1>, scalar_prefetch = 0 : i64, scratch_operands = 0 : i64, tpu.core_type = #tpu.core_type<tc>, window_params = [{transform_indices = @transform_0, window_bounds = array<i64: 4, 2>}, {pipeline_mode = #tpu.pipeline_mode<synchronous>, transform_indices = @transform_1, window_bounds = array<i64: 128, 4>}, {pipeline_mode = #tpu.pipeline_mode<synchronous>, transform_indices = @transform_2, window_bounds = array<i64: 128, 1>}, {pipeline_mode = #tpu.pipeline_mode<synchronous>, transform_indices = @transform_3, window_bounds = array<i64: 2, 128>}, {pipeline_mode = #tpu.pipeline_mode<synchronous>, transform_indices = @transform_4, window_bounds = array<i64: 2, 1>}, {transform_indices = @transform_5, window_bounds = array<i64: 2, 2>}, {transform_indices = @transform_6, window_bounds = array<i64: 2, 2>}]} {
    %c0 = arith.constant 0 : index
    %c0_0 = arith.constant 0 : index
    %0 = vector.load %arg1[%c0, %c0_0] : memref<4x2xf32, #tpu.memory_space<vmem>>, vector<4x2xf32>
    %c0_1 = arith.constant 0 : index
    %c0_2 = arith.constant 0 : index
    %1 = vector.load %arg2[%c0_1, %c0_2] : memref<128x4xf32, #tpu.memory_space<vmem>>, vector<128x4xf32>
    %cst = arith.constant dense<0.000000e+00> : vector<128x2xf32>
    %2 = tpu.matmul %1, %0, %cst {dimension_numbers = #tpu.dot_dimension_numbers<[1], [0], [0], [1], [0, 0, 1, 1], [], []>} : vector<128x4xf32>, vector<4x2xf32>, vector<128x2xf32> -> vector<128x2xf32>
    %c0_3 = arith.constant 0 : index
    %c0_4 = arith.constant 0 : index
    %3 = vector.load %arg3[%c0_3, %c0_4] : memref<128x1xf32, #tpu.memory_space<vmem>>, vector<128x1xf32>
    %4 = vector.broadcast %3 : vector<128x1xf32> to vector<128x2xf32>
    %5 = arith.addf %2, %4 : vector<128x2xf32>
    %cst_5 = arith.constant 0.000000e+00 : f32
    %6 = vector.broadcast %cst_5 : f32 to vector<128x2xf32>
    %7 = arith.maximumf %5, %6 : vector<128x2xf32>
    %c0_6 = arith.constant 0 : index
    %c0_7 = arith.constant 0 : index
    %8 = vector.load %arg4[%c0_6, %c0_7] : memref<2x128xf32, #tpu.memory_space<vmem>>, vector<2x128xf32>
    %cst_8 = arith.constant dense<0.000000e+00> : vector<2x2xf32>
    %9 = tpu.matmul %8, %7, %cst_8 {dimension_numbers = #tpu.dot_dimension_numbers<[1], [0], [0], [1], [0, 0, 1, 1], [], []>} : vector<2x128xf32>, vector<128x2xf32>, vector<2x2xf32> -> vector<2x2xf32>
    %c0_9 = arith.constant 0 : index
    %c0_10 = arith.constant 0 : index
    %10 = vector.load %arg5[%c0_9, %c0_10] : memref<2x1xf32, #tpu.memory_space<vmem>>, vector<2x1xf32>
    %11 = vector.broadcast %10 : vector<2x1xf32> to vector<2x2xf32>
    %12 = arith.addf %9, %11 : vector<2x2xf32>
    %cst_11 = arith.constant dense<0xFF800000> : vector<2xf32>
    %13 = vector.multi_reduction <maximumf>, %12, %cst_11 [0] : vector<2x2xf32> to vector<2xf32>
    %14 = vector.shape_cast %13 : vector<2xf32> to vector<1x2xf32>
    %15 = vector.broadcast %14 : vector<1x2xf32> to vector<2x2xf32>
    %16 = arith.subf %12, %15 : vector<2x2xf32>
    %17 = math.exp %16 : vector<2x2xf32>
    %cst_12 = arith.constant dense<0.000000e+00> : vector<2xf32>
    %18 = vector.multi_reduction <add>, %17, %cst_12 [0] : vector<2x2xf32> to vector<2xf32>
    %19 = vector.shape_cast %18 : vector<2xf32> to vector<1x2xf32>
    %20 = math.log %19 : vector<1x2xf32>
    %21 = vector.broadcast %20 : vector<1x2xf32> to vector<2x2xf32>
    %22 = arith.subf %16, %21 : vector<2x2xf32>
    %c0_13 = arith.constant 0 : index
    %c0_14 = arith.constant 0 : index
    %23 = vector.load %arg7[%c0_13, %c0_14] : memref<2x2xf32, #tpu.memory_space<vmem>>, vector<2x2xf32>
    tpu.vector_store %arg7[%c0_13, %c0_14], %22 {strides = array<i32>} : memref<2x2xf32, #tpu.memory_space<vmem>>, vector<2x2xf32>,
    %24 = math.exp %22 : vector<2x2xf32>
    %c0_15 = arith.constant 0 : index
    %c0_16 = arith.constant 0 : index
    %25 = vector.load %arg6[%c0_15, %c0_16] : memref<2x2xf32, #tpu.memory_space<vmem>>, vector<2x2xf32>
    tpu.vector_store %arg6[%c0_15, %c0_16], %24 {strides = array<i32>} : memref<2x2xf32, #tpu.memory_space<vmem>>, vector<2x2xf32>,
    return
  }
  func.func @transform_0(%arg0: i32) -> (i32, i32) {
    %c0_i32 = arith.constant 0 : i32
    %c0_i32_0 = arith.constant 0 : i32
    return %c0_i32, %arg0 : i32, i32
  }
  func.func @transform_1(%arg0: i32) -> (i32, i32) {
    %c0_i32 = arith.constant 0 : i32
    %c0_i32_0 = arith.constant 0 : i32
    %c0_i32_1 = arith.constant 0 : i32
    return %c0_i32, %c0_i32_0 : i32, i32
  }
  func.func @transform_2(%arg0: i32) -> (i32, i32) {
    %c0_i32 = arith.constant 0 : i32
    %c0_i32_0 = arith.constant 0 : i32
    %c0_i32_1 = arith.constant 0 : i32
    return %c0_i32, %c0_i32_0 : i32, i32
  }
  func.func @transform_3(%arg0: i32) -> (i32, i32) {
    %c0_i32 = arith.constant 0 : i32
    %c0_i32_0 = arith.constant 0 : i32
    %c0_i32_1 = arith.constant 0 : i32
    return %c0_i32, %c0_i32_0 : i32, i32
  }
  func.func @transform_4(%arg0: i32) -> (i32, i32) {
    %c0_i32 = arith.constant 0 : i32
    %c0_i32_0 = arith.constant 0 : i32
    %c0_i32_1 = arith.constant 0 : i32
    return %c0_i32, %c0_i32_0 : i32, i32
  }
  func.func @transform_5(%arg0: i32) -> (i32, i32) {
    %c0_i32 = arith.constant 0 : i32
    %c0_i32_0 = arith.constant 0 : i32
    return %c0_i32, %arg0 : i32, i32
  }
  func.func @transform_6(%arg0: i32) -> (i32, i32) {
    %c0_i32 = arith.constant 0 : i32
    %c0_i32_0 = arith.constant 0 : i32
    return %c0_i32, %arg0 : i32, i32
  }
}

</mosaic_0001>

<bundles_post_ra>
// kernel: tpu_custom_call.1
= control target key start
LH: loop header
LB: loop body
LE: loop exit
PB: predicated region body
PF: predicated region fallthrough
CT: control target
= control target key end

     0   :  { %12 = vsyncpa [#allocation3], 0  ;;  %vm186_vm0 = vcmask 1043456   ;;  %v438_v3 = vmov 0   ;;  %vm137_vm1 = vcmask 31744   ;;  %s613_s0 = inlined_call_operand.vmem [shape: f32[4,2], index: 0, kind: input, shape index: {}]   ;;  %s614_s1 = inlined_call_operand.vmem [shape: f32[128,4], index: 1, kind: input, shape index: {}]   ;;  %s615_s2 = inlined_call_operand.vmem [shape: f32[128,1], index: 2, kind: input, shape index: {}]   ;;  %s616_s3 = inlined_call_operand.vmem [shape: f32[2,128], index: 3, kind: input, shape index: {}]   ;;  %s617_s4 = inlined_call_operand.vmem [shape: f32[2,1], index: 4, kind: input, shape index: {}]   ;;  %s618_s5 = inlined_call_operand.hbm [shape: f32[2,2], index: 5, kind: output, shape index: {0}]   ;;  %s619_s6 = inlined_call_operand.hbm [shape: f32[2,2], index: 6, kind: output, shape index: {1}]  }
   0x1   :  { %v24_v0 = vld [vmem:[%s613_s0] sm:$0xf]  ;;  %v56_v1 = vld [vmem:[%s615_s2 + $0x78] sm:$0xff]  ;;  %377 = vset.pattern.permute.xlu0 %v438_v3  ;;  %v31_v4 = vld [vmem:[%s614_s1 + $0x30] sm:$0xff]  ;;  %378 = vset.pattern.permute.xlu1 %v438_v3 }
   0x2   :  { %v25_v2 = vld [vmem:[%s614_s1] sm:$0xff]  ;;  %355 = vmatpush.msk.msra.mxu0 %vm186_vm0, %v24_v0  ;;  %372 = vmatpush.msk.msra.mxu2 %vm186_vm0, %v24_v0  ;;  %v54_v6 = vld [vmem:[%s615_s2 + $0x68] sm:$0xff]  ;;  %v52_v7 = vld [vmem:[%s615_s2 + $0x58] sm:$0xff] }
   0x3   :  { %v37_v5 = vld [vmem:[%s614_s1 + $0x60] sm:$0xff]  ;;  %373 = vmatpush.msk.msra.mxu3 %vm186_vm0, %v24_v0  ;;  %134 = vperm.xlu0 %377, %v56_v1   ;;  %v55_v8 = vld [vmem:[%s615_s2 + $0x70] sm:$0xff]  ;;  %v26_v9 = vld [vmem:[%s614_s1 + $0x8] sm:$0xff] }
   0x4   :  { %356 = vmatmul.msk.f32.vlgmr.msra.gmra.mxu0 %vm137_vm1, %v25_v2  ;;  %362 = vmatmul.msk.f32.vlgmr.msra.gmra.mxu2 %vm137_vm1, %v31_v4  ;;  %v32_v10 = vld [vmem:[%s614_s1 + $0x38] sm:$0xff]  ;;  %v38_v11 = vld [vmem:[%s614_s1 + $0x68] sm:$0xff] }
   0x5   :  { %368 = vmatmul.msk.f32.vlgmr.msra.gmra.mxu3 %vm137_vm1, %v37_v5  ;;  %379 = vset.pattern.permute.xlu2 %v438_v3 }
   0x6   :  { %124 = vperm.xlu1 %378, %v54_v6   ;;  %114 = vperm.xlu2 %379, %v52_v7  }
   0x7   :  { %13 = vsyncpa [#allocation5], 0  ;;  %v53_v12 = vld [vmem:[%s615_s2 + $0x60] sm:$0xff]  ;;  %v51_v13 = vld [vmem:[%s615_s2 + $0x50] sm:$0xff]  ;;  %vm298_vm2 = vcmask 9216   ;;  %s341_s16 = sshll.u32 %s619_s6, 4  ;;  %s342_s16 = int_to_ptr.hbm [resolvable:$true] %s341_s16 }
   0x8   :  { %v50_v14 = vld [vmem:[%s615_s2 + $0x48] sm:$0xff]  ;;  %v27_v15 = vld [vmem:[%s614_s1 + $0x10] sm:$0xff]  ;;  %v33_v16 = vld [vmem:[%s614_s1 + $0x40] sm:$0xff]  ;;  %s440_s17 = smov [#allocation2]   ;;  %s330_s21 = sshll.u32 %s618_s5, 4  ;;  %s331_s21 = int_to_ptr.hbm [resolvable:$true] %s330_s21 }
   0x9   :  { %v39_v17 = vld [vmem:[%s614_s1 + $0x70] sm:$0xff]  ;;  %v49_v18 = vld [vmem:[%s615_s2 + $0x40] sm:$0xff]  ;;  %v48_v19 = vld [vmem:[%s615_s2 + $0x38] sm:$0xff]  ;;  %s328_s18 = sshll.u32 %s440_s17, 4  ;;  %s329_s18 = int_to_ptr.vmem [resolvable:$true] %s328_s18 }
   0xa   :  { %v47_v20 = vld [vmem:[%s615_s2 + $0x30] sm:$0xff]  ;;  %v28_v21 = vld [vmem:[%s614_s1 + $0x18] sm:$0xff]  ;;  %v34_v22 = vld [vmem:[%s614_s1 + $0x48] sm:$0xff] }
   0xb   :  { %129 = vperm.xlu0 %377, %v55_v8   ;;  %v40_v23 = vld [vmem:[%s614_s1 + $0x78] sm:$0xff]  ;;  %v46_v24 = vld [vmem:[%s615_s2 + $0x28] sm:$0xff]  ;;  %v45_v25 = vld [vmem:[%s615_s2 + $0x20] sm:$0xff] }
   0xc   :  { %357 = vmatmul.msk.f32.gmra.mxu0 %vm137_vm1, %v26_v9  ;;  %363 = vmatmul.msk.f32.gmra.mxu2 %vm137_vm1, %v32_v10  ;;  %v44_v26 = vld [vmem:[%s615_s2 + $0x18] sm:$0xff]  ;;  %v29_v27 = vld [vmem:[%s614_s1 + $0x20] sm:$0xff]  ;;  %v35_v28 = vld [vmem:[%s614_s1 + $0x50] sm:$0xff] }
   0xd   :  { %369 = vmatmul.msk.f32.gmra.mxu3 %vm137_vm1, %v38_v11  ;;  %v43_v29 = vld [vmem:[%s615_s2 + $0x10] sm:$0xff]  ;;  %v42_v30 = vld [vmem:[%s615_s2 + $0x8] sm:$0xff]  ;;  %v41_v31 = vld [vmem:[%s615_s2] sm:$0xff] }
   0xe   :  { %119 = vperm.xlu1 %378, %v53_v12   ;;  %109 = vperm.xlu2 %379, %v51_v13   ;;  %v30_v32 = vld [vmem:[%s614_s1 + $0x28] sm:$0xff]  ;;  %v36_v33 = vld [vmem:[%s614_s1 + $0x58] sm:$0xff]  ;;  %v272_v34 = vld [vmem:[%s617_s4] sm:$0x3] }
  0x13   :  { %104 = vperm.xlu0 %377, %v50_v14  }
  0x14   :  { %358 = vmatmul.msk.f32.gmra.mxu0 %vm137_vm1, %v27_v15  ;;  %364 = vmatmul.msk.f32.gmra.mxu2 %vm137_vm1, %v33_v16 }
  0x15   :  { %370 = vmatmul.msk.f32.gmra.mxu3 %vm137_vm1, %v39_v17 }
  0x16   :  { %99 = vperm.xlu1 %378, %v49_v18   ;;  %94 = vperm.xlu2 %379, %v48_v19  }
  0x1b   :  { %89 = vperm.xlu0 %377, %v47_v20  }
  0x1c   :  { %359 = vmatmul.msk.f32.gmra.mxu0 %vm137_vm1, %v28_v21  ;;  %365 = vmatmul.msk.f32.gmra.mxu2 %vm137_vm1, %v34_v22 }
  0x1d   :  { %371 = vmatmul.msk.f32.gmra.mxu3 %vm137_vm1, %v40_v23 }
  0x1e   :  { %84 = vperm.xlu1 %378, %v46_v24   ;;  %79 = vperm.xlu2 %379, %v45_v25  }
  0x23   :  { %74 = vperm.xlu0 %377, %v44_v26  }
  0x24   :  { %360 = vmatmul.msk.f32.gmra.mxu0 %vm137_vm1, %v29_v27  ;;  %366 = vmatmul.msk.f32.gmra.mxu2 %vm137_vm1, %v35_v28 }
  0x26   :  { %69 = vperm.xlu1 %378, %v43_v29   ;;  %64 = vperm.xlu2 %379, %v42_v30  }
  0x2b   :  { %59 = vperm.xlu0 %377, %v41_v31  }
  0x2c   :  { %361 = vmatmul.msk.f32.gmra.mxu0 %vm137_vm1, %v30_v32  ;;  %367 = vmatmul.msk.f32.gmra.mxu2 %vm137_vm1, %v36_v33 }
  0x2e   :  { %275 = vperm.xlu1 %378, %v272_v34  }
  0x60   :  { %v115_v43 = vpop.permute.xlu2 %114 }
  0x68   :  { %v110_v53 = vpop.permute.xlu2 %109 }
  0x70   :  { %v95_v0 = vpop.permute.xlu2 %94 }
  0x75   :  { %v135_v38 = vpop.permute.xlu0 %134 }
  0x78   :  { %v125_v42 = vpop.permute.xlu1 %124  ;;  %v80_v11 = vpop.permute.xlu2 %79 }
  0x7d   :  { %v130_v46 = vpop.permute.xlu0 %129 }
  0x80   :  { %v120_v52 = vpop.permute.xlu1 %119  ;;  %v65_v25 = vpop.permute.xlu2 %64 }
  0x81   :  { %v594_v35 = vpop.f32.mrf.mxu0 }
  0x85   :  { %v105_v56 = vpop.permute.xlu0 %104 }
  0x87   :  { %v225_v36 = vpop.f32.mrf.mxu2 }
  0x88   :  { %v243_v37 = vpop.f32.mrf.mxu3  ;;  %v100_v63 = vpop.permute.xlu1 %99 }
  0x89   :  { %v596_v39 = vpop.f32.mrf.mxu0  ;;  %v244_v58 = vadd.f32 %v243_v37, %v120_v52 }
  0x8a   :  { %v211_v30 = vadd.f32 %v596_v39, %v65_v25 }
  0x8b   :  { %v267_v62 = vmax.f32 %v244_v58, 0.0 }
  0x8c   :  { %v256_v33 = vmax.f32 %v211_v30, 0.0 }
  0x8d   :  { %v90_v1 = vpop.permute.xlu0 %89 }
  0x8e   :  { %v226_v16 = vadd.f32 %v225_v36, %v90_v1  ;;  %v271_v36 = vld [vmem:[%s616_s3] sm:$0x3]  ;;  %s439_s3 = smov [#allocation4]  }
  0x8f   :  { %v228_v40 = vpop.f32.mrf.mxu2  ;;  %s339_s4 = sshll.u32 %s439_s3, 4  ;;  %s340_s4 = int_to_ptr.vmem [resolvable:$true] %s339_s4 }
  0x90   :  { %v246_v41 = vpop.f32.mrf.mxu3  ;;  %v85_v10 = vpop.permute.xlu1 %84  ;;  %v229_v12 = vadd.f32 %v228_v40, %v95_v0  ;;  %v261_v20 = vmax.f32 %v226_v16, 0.0 }
  0x91   :  { %v213_v47 = vpop.f32.mrf.mxu0  ;;  %v247_v54 = vadd.f32 %v246_v41, %v125_v42 }
  0x92   :  { %v262_v18 = vmax.f32 %v229_v12, 0.0 }
  0x93   :  { %v268_v60 = vmax.f32 %v247_v54, 0.0 }
  0x95   :  { %v75_v14 = vpop.permute.xlu0 %74 }
  0x97   :  { %v231_v44 = vpop.f32.mrf.mxu2 }
  0x98   :  { %v249_v45 = vpop.f32.mrf.mxu3  ;;  %v232_v8 = vadd.f32 %v231_v44, %v100_v63  ;;  %v70_v24 = vpop.permute.xlu1 %69 }
  0x99   :  { %v250_v50 = vadd.f32 %v249_v45, %v130_v46  ;;  %v216_v57 = vpop.f32.mrf.mxu0  ;;  %v214_v26 = vadd.f32 %v213_v47, %v70_v24 }
  0x9a   :  { %v263_v17 = vmax.f32 %v232_v8, 0.0  ;;  %v217_v22 = vadd.f32 %v216_v57, %v75_v14 }
  0x9b   :  { %v269_v59 = vmax.f32 %v250_v50, 0.0  ;;  %v257_v31 = vmax.f32 %v214_v26, 0.0 }
  0x9c   :  { %v258_v29 = vmax.f32 %v217_v22, 0.0 }
  0x9d   :  { %v60_v28 = vpop.permute.xlu0 %59 }
  0x9e   :  { %v208_v32 = vadd.f32 %v594_v35, %v60_v28 }
  0x9f   :  { %v234_v48 = vpop.f32.mrf.mxu2 }
  0xa0   :  { %v252_v49 = vpop.f32.mrf.mxu3  ;;  %v235_v6 = vadd.f32 %v234_v48, %v105_v56  ;;  %v255_v34 = vmax.f32 %v208_v32, 0.0  ;;  %v276_v37 = vpop.permute.xlu1 %275 }
  0xa1   :  { %v253_v51 = vadd.f32 %v252_v49, %v135_v38  ;;  %v219_v2 = vpop.f32.mrf.mxu0 }
  0xa2   :  { %v264_v13 = vmax.f32 %v235_v6, 0.0  ;;  %v220_v21 = vadd.f32 %v219_v2, %v80_v11 }
  0xa3   :  { %v270_v55 = vmax.f32 %v253_v51, 0.0 }
  0xa4   :  { %v259_v27 = vmax.f32 %v220_v21, 0.0 }
  0xa5   :  { %278 = vmatpush.msra.mxu1 %v270_v55 }
  0xa7   :  { %279 = vmatpush.msra.mxu1 %v269_v59  ;;  %v237_v61 = vpop.f32.mrf.mxu2 }
  0xa8   :  { %v238_v4 = vadd.f32 %v237_v61, %v110_v53 }
  0xa9   :  { %280 = vmatpush.msra.mxu1 %v268_v60  ;;  %v222_v15 = vpop.f32.mrf.mxu0 }
  0xaa   :  { %v265_v9 = vmax.f32 %v238_v4, 0.0  ;;  %v223_v19 = vadd.f32 %v222_v15, %v85_v10 }
  0xab   :  { %281 = vmatpush.msra.mxu1 %v267_v62 }
  0xac   :  { %v260_v23 = vmax.f32 %v223_v19, 0.0 }
  0xaf   :  { %v240_v3 = vpop.f32.mrf.mxu2 }
  0xb0   :  { %v241_v5 = vadd.f32 %v240_v3, %v115_v43 }
  0xb2   :  { %v266_v7 = vmax.f32 %v241_v5, 0.0 }
  0xb4   :  { %282 = vmatpush.msra.mxu1 %v266_v7 }
  0xb6   :  { %283 = vmatpush.msra.mxu1 %v265_v9 }
  0xb8   :  { %284 = vmatpush.msra.mxu1 %v264_v13 }
  0xba   :  { %285 = vmatpush.msra.mxu1 %v263_v17 }
  0xbc   :  { %286 = vmatpush.msra.mxu1 %v262_v18 }
  0xbe   :  { %287 = vmatpush.msra.mxu1 %v261_v20 }
  0xc0   :  { %288 = vmatpush.msra.mxu1 %v260_v23 }
  0xc2   :  { %289 = vmatpush.msra.mxu1 %v259_v27 }
  0xc4   :  { %290 = vmatpush.msra.mxu1 %v258_v29 }
  0xc6   :  { %291 = vmatpush.msra.mxu1 %v257_v31 }
  0xc8   :  { %292 = vmatpush.msra.mxu1 %v256_v33 }
  0xca   :  { %293 = vmatpush.msra.mxu1 %v255_v34 }
  0xcb   :  { %294 = vmatmul.f32.vlgmr.msra.gmra.mxu1 %v271_v36 }
 0x148   :  { %v295_v38 = vpop.f32.mrf.mxu1 }
 0x149   :  { %v296_v40 = vadd.f32 %v295_v38, %v276_v37 }
 0x14b   :  { %v299_v39 = vsel %vm298_vm2, %v296_v40, -inf }
 0x14c   :  { %v300_v41 = vrot.slane %v299_v39, 4 }
 0x14e   :  { %v301_v42 = vmax.f32 %v299_v39, %v300_v41 }
 0x150   :  { %v302_v35 = vrot.slane %v301_v42, 2 }
 0x152   :  { %v303_v43 = vmax.f32 %v301_v42, %v302_v35 }
 0x154   :  { %v304_v44 = vrot.slane %v303_v43, 1 }
 0x156   :  { %v305_v45 = vmax.f32 %v303_v43, %v304_v44 }
 0x158   :  { %v306_v46 = vsub.f32 %v296_v40, %v305_v45 }
 0x15a   :  { %v307_v47 = vmul.f32 1.442695, %v306_v46 }
 0x15c   :  { %380 = vpow2.f32 %v307_v47 }
 0x162   :  { %v381_v48 = vpop.eup %380 }
 0x163   :  { %v309_v49 = vsel %vm298_vm2, %v381_v48, 0.0 }
 0x164   :  { %v310_v50 = vrot.slane %v309_v49, 4 }
 0x166   :  { %v311_v51 = vadd.f32 %v310_v50, %v309_v49 }
 0x168   :  { %v312_v52 = vrot.slane %v311_v51, 2 }
 0x16a   :  { %v313_v53 = vadd.f32 %v312_v52, %v311_v51 }
 0x16c   :  { %v314_v54 = vrot.slane %v313_v53, 1 }
 0x16e   :  { %v315_v55 = vadd.f32 %v314_v54, %v313_v53 }
 0x170   :  { %382 = vlog2.f32 %v315_v55 }
 0x176   :  { %v383_v56 = vpop.eup %382 }
 0x177   :  { %v317_v57 = vmul.f32 0.6931472, %v383_v56 }
 0x179   :  { %v318_v58 = vsub.f32 %v306_v46, %v317_v57 }
 0x17b   :  { %v320_v59 = vmul.f32 1.442695, %v318_v58  ;;  %319 = vst.msk [vmem:[#allocation4] sm:$0x3] %vm298_vm2, %v318_v58 }
 0x17c   :  { %344 = dma.vmem_to_hbm [thread:$0]  %s340_s4, 32, %s342_s16, [#allocation5]  }
 0x17d   :  { %384 = vpow2.f32 %v320_v59 }
 0x183   :  { %v385_v60 = vpop.eup %384 }
 0x184   :  { %322 = vst.msk [vmem:[#allocation2] sm:$0x3] %vm298_vm2, %v385_v60 }
 0x185   :  { %333 = dma.vmem_to_hbm [thread:$0]  %s329_s18, 32, %s331_s21, [#allocation3]  }
 0x186   :  { %434 = dma.done.wait [#allocation3], 32  }
 0x187   :  { %435 = vsyncadd [#allocation3], 4294967264 }
 0x188   :  { %436 = dma.done.wait [#allocation5], 32  }
 0x189   :  { %437 = vsyncadd [#allocation5], 4294967264 }
 0x18a   :  { %353 = vsyncpa [#allocation3], 1 }
 0x18b   :  { %354 = vsyncpa [#allocation5], 1 }

</bundles_post_ra>
